<compile_context>
chip_gen: v6e
topology: v6e:2x2x1
jax: 0.10.0
libtpu: 0.0.40
codegen_flags: <defaults>
</compile_context>

<pallas_src>
import functools

import jax
import jax.numpy as jnp
from jax.experimental import pallas as pl
from jax.experimental.pallas import tpu as pltpu


def _round_up(x, m):
    return (x + m - 1) // m * m


def decoder_kernel(z_ref, w3_ref, b3_ref, w4_ref, b4_ref, out_ref):
    # Layer 1: h = relu(z @ W3 + b3)
    # bf16 MXU operands, f32 accumulation; elementwise math kept in f32.
    z = z_ref[...].astype(jnp.bfloat16)
    h = jnp.dot(z, w3_ref[...], preferred_element_type=jnp.float32)
    h = jnp.maximum(h + b3_ref[...], 0.0)          # (TB,Hp) + (1,Hp) broadcast

    # Layer 2: y = sigmoid(h @ W4 + b4)
    # Cast h to bf16: halves its footprint and is the native MXU operand dtype.
    y = jnp.dot(h.astype(jnp.bfloat16), w4_ref[...],
                preferred_element_type=jnp.float32)
    out_ref[...] = jax.nn.sigmoid(y + b4_ref[...]).astype(out_ref.dtype)


def prepare_decoder_params(w3, b3, w4, b4):
    """Pad lane dims to multiples of 128 and cast weights to bf16 (done once).

    Zero padding is safe: padded hidden lanes produce relu(0 + 0) = 0, and the
    corresponding padded rows of W4 are zero, so they contribute nothing; the
    padded output lanes are sliced off by the wrapper.
    """
    C, H = w3.shape
    O = w4.shape[1]
    Hp, Op = _round_up(H, 128), _round_up(O, 128)
    w3p = jnp.zeros((C, Hp), jnp.bfloat16).at[:, :H].set(w3.astype(jnp.bfloat16))
    b3p = jnp.zeros((1, Hp), jnp.float32).at[:, :H].set(b3.reshape(1, H))
    w4p = jnp.zeros((Hp, Op), jnp.bfloat16).at[:H, :O].set(w4.astype(jnp.bfloat16))
    b4p = jnp.zeros((1, Op), jnp.float32).at[:, :O].set(b4.reshape(1, O))
    return (w3p, b3p, w4p, b4p), (H, O)


@functools.partial(jax.jit, static_argnames=("out_dim", "batch_tile"))
def decoder_forward(z, w3p, b3p, w4p, b4p, *, out_dim, batch_tile=128):
    """z: (B, C) f32; padded/bf16 params from prepare_decoder_params.

    Returns (B, out_dim) f32.
    """
    B, C = z.shape
    Hp = w3p.shape[1]
    Op = w4p.shape[1]

    # Batch tile: multiple of 8 sublanes; pad the batch so it divides evenly.
    tb = min(batch_tile, _round_up(B, 8))
    Bp = _round_up(B, tb)
    zp = z if Bp == B else jnp.pad(z, ((0, Bp - B), (0, 0)))
    num_tiles = Bp // tb

    flops = 2 * Bp * (C * Hp + Hp * Op)
    bytes_accessed = (zp.size * 4 + w3p.size * 2 + w4p.size * 2
                      + b3p.size * 4 + b4p.size * 4 + Bp * Op * 4)

    out = pl.pallas_call(
        decoder_kernel,
        out_shape=jax.ShapeDtypeStruct((Bp, Op), jnp.float32),
        grid=(num_tiles,),
        in_specs=[
            pl.BlockSpec((tb, C), lambda i: (i, 0)),    # z: tiled on batch
            pl.BlockSpec((C, Hp), lambda i: (0, 0)),    # weights/biases keep a
            pl.BlockSpec((1, Hp), lambda i: (0, 0)),    # constant block index ->
            pl.BlockSpec((Hp, Op), lambda i: (0, 0)),   # resident in VMEM, no
            pl.BlockSpec((1, Op), lambda i: (0, 0)),    # re-DMA across iterations
        ],
        out_specs=pl.BlockSpec((tb, Op), lambda i: (i, 0)),
        compiler_params=pltpu.CompilerParams(
            dimension_semantics=("parallel",)),
        cost_estimate=pl.CostEstimate(
            flops=flops,
            transcendentals=Bp * Op,
            bytes_accessed=bytes_accessed),
    )(zp, w3p, b3p, w4p, b4p)

    return out[:B, :out_dim]


def init_params(key, c, hidden=400, out=784):
    """Deterministic init mimicking nn.Linear default (uniform +/- 1/sqrt(fan_in)).

    Weights stored as (in, out) so the kernel computes x @ W directly.
    """
    k3w, k3b, k4w, k4b = jax.random.split(key, 4)
    lim3 = 1.0 / jnp.sqrt(c)
    lim4 = 1.0 / jnp.sqrt(hidden)
    w3 = jax.random.uniform(k3w, (c, hidden), jnp.float32, -lim3, lim3)
    b3 = jax.random.uniform(k3b, (1, hidden), jnp.float32, -lim3, lim3)
    w4 = jax.random.uniform(k4w, (hidden, out), jnp.float32, -lim4, lim4)
    b4 = jax.random.uniform(k4b, (1, out), jnp.float32, -lim4, lim4)
    return w3, b3, w4, b4


def decoder_ref_f32(z, w3, b3, w4, b4):
    """Pure-JAX f32 reference matching the PyTorch forward."""
    h = jnp.maximum(z @ w3 + b3, 0.0)
    return jax.nn.sigmoid(h @ w4 + b4)


def decoder_ref_bf16(z, w3, b3, w4, b4):
    """Reference with the same bf16-operand / f32-accumulate math as the kernel."""
    h = jnp.dot(z.astype(jnp.bfloat16), w3.astype(jnp.bfloat16),
                preferred_element_type=jnp.float32) + b3
    h = jnp.maximum(h, 0.0)
    y = jnp.dot(h.astype(jnp.bfloat16), w4.astype(jnp.bfloat16),
                preferred_element_type=jnp.float32) + b4
    return jax.nn.sigmoid(y)


if __name__ == "__main__":
    B, C = 8, 32
    key = jax.random.PRNGKey(0)
    kz, kp = jax.random.split(key)
    z = jax.random.normal(kz, (B, C), jnp.float32)
    w3, b3, w4, b4 = init_params(kp, C)

    (w3p, b3p, w4p, b4p), (H, O) = prepare_decoder_params(w3, b3, w4, b4)

    out = decoder_forward(z, w3p, b3p, w4p, b4p, out_dim=O)
    out = jax.block_until_ready(out)
    assert out.shape == (B, O), out.shape

    # Match the bf16-operand reference tightly...
    ref_bf16 = decoder_ref_bf16(z, w3, b3, w4, b4)
    assert jnp.allclose(out, ref_bf16, atol=2e-3, rtol=2e-3), \
        float(jnp.max(jnp.abs(out - ref_bf16)))
    # ...and the full f32 reference within bf16-weight tolerance.
    ref_f32 = decoder_ref_f32(z, w3, b3, w4, b4)
    assert jnp.allclose(out, ref_f32, atol=5e-2), \
        float(jnp.max(jnp.abs(out - ref_f32)))

    print("KERNEL_OK")
</pallas_src>

<mosaic_0001>
module attributes {stable_mosaic.version = 11 : i64} {
  func.func @decoder_kernel(%arg0: i32, %arg1: memref<8x32xf32, #tpu.memory_space<vmem>>, %arg2: memref<32x512xbf16, #tpu.memory_space<vmem>>, %arg3: memref<1x512xf32, #tpu.memory_space<vmem>>, %arg4: memref<512x896xbf16, #tpu.memory_space<vmem>>, %arg5: memref<1x896xf32, #tpu.memory_space<vmem>>, %arg6: memref<8x896xf32, #tpu.memory_space<vmem>>) attributes {dimension_semantics = [#tpu.dimension_semantics<parallel>], iteration_bounds = array<i64: 1>, scalar_prefetch = 0 : i64, scratch_operands = 0 : i64, tpu.core_type = #tpu.core_type<tc>, window_params = [{transform_indices = @transform_0, window_bounds = array<i64: 8, 32>}, {pipeline_mode = #tpu.pipeline_mode<synchronous>, transform_indices = @transform_1, window_bounds = array<i64: 32, 512>}, {pipeline_mode = #tpu.pipeline_mode<synchronous>, transform_indices = @transform_2, window_bounds = array<i64: 1, 512>}, {pipeline_mode = #tpu.pipeline_mode<synchronous>, transform_indices = @transform_3, window_bounds = array<i64: 512, 896>}, {pipeline_mode = #tpu.pipeline_mode<synchronous>, transform_indices = @transform_4, window_bounds = array<i64: 1, 896>}, {transform_indices = @transform_5, window_bounds = array<i64: 8, 896>}]} {
    %c0 = arith.constant 0 : index
    %c0_0 = arith.constant 0 : index
    %0 = vector.load %arg1[%c0, %c0_0] : memref<8x32xf32, #tpu.memory_space<vmem>>, vector<8x32xf32>
    %1 = arith.truncf %0 : vector<8x32xf32> to vector<8x32xbf16>
    %c0_1 = arith.constant 0 : index
    %c0_2 = arith.constant 0 : index
    %2 = vector.load %arg2[%c0_1, %c0_2] : memref<32x512xbf16, #tpu.memory_space<vmem>>, vector<32x512xbf16>
    %cst = arith.constant dense<0.000000e+00> : vector<8x512xf32>
    %3 = tpu.matmul %1, %2, %cst {dimension_numbers = #tpu.dot_dimension_numbers<[1], [0], [0], [1], [0, 0, 1, 1], [], []>} : vector<8x32xbf16>, vector<32x512xbf16>, vector<8x512xf32> -> vector<8x512xf32>
    %c0_3 = arith.constant 0 : index
    %c0_4 = arith.constant 0 : index
    %4 = vector.load %arg3[%c0_3, %c0_4] : memref<1x512xf32, #tpu.memory_space<vmem>>, vector<1x512xf32>
    %5 = vector.broadcast %4 : vector<1x512xf32> to vector<8x512xf32>
    %6 = arith.addf %3, %5 : vector<8x512xf32>
    %cst_5 = arith.constant 0.000000e+00 : f32
    %7 = vector.broadcast %cst_5 : f32 to vector<8x512xf32>
    %8 = arith.maximumf %6, %7 : vector<8x512xf32>
    %9 = arith.truncf %8 : vector<8x512xf32> to vector<8x512xbf16>
    %c0_6 = arith.constant 0 : index
    %c0_7 = arith.constant 0 : index
    %10 = vector.load %arg4[%c0_6, %c0_7] : memref<512x896xbf16, #tpu.memory_space<vmem>>, vector<512x896xbf16>
    %cst_8 = arith.constant dense<0.000000e+00> : vector<8x896xf32>
    %11 = tpu.matmul %9, %10, %cst_8 {dimension_numbers = #tpu.dot_dimension_numbers<[1], [0], [0], [1], [0, 0, 1, 1], [], []>} : vector<8x512xbf16>, vector<512x896xbf16>, vector<8x896xf32> -> vector<8x896xf32>
    %c0_9 = arith.constant 0 : index
    %c0_10 = arith.constant 0 : index
    %12 = vector.load %arg5[%c0_9, %c0_10] : memref<1x896xf32, #tpu.memory_space<vmem>>, vector<1x896xf32>
    %13 = vector.broadcast %12 : vector<1x896xf32> to vector<8x896xf32>
    %14 = arith.addf %11, %13 : vector<8x896xf32>
    %15 = arith.negf %14 : vector<8x896xf32>
    %16 = math.exp %15 : vector<8x896xf32>
    %cst_11 = arith.constant 1.000000e+00 : f32
    %17 = vector.broadcast %cst_11 : f32 to vector<8x896xf32>
    %18 = arith.addf %17, %16 : vector<8x896xf32>
    %19 = arith.divf %17, %18 : vector<8x896xf32>
    %c0_12 = arith.constant 0 : index
    %c0_13 = arith.constant 0 : index
    %20 = vector.load %arg6[%c0_12, %c0_13] : memref<8x896xf32, #tpu.memory_space<vmem>>, vector<8x896xf32>
    tpu.vector_store %arg6[%c0_12, %c0_13], %19 {strides = array<i32>} : memref<8x896xf32, #tpu.memory_space<vmem>>, vector<8x896xf32>,
    return
  }
  func.func @transform_0(%arg0: i32) -> (i32, i32) {
    %c0_i32 = arith.constant 0 : i32
    %c0_i32_0 = arith.constant 0 : i32
    return %arg0, %c0_i32 : i32, i32
  }
  func.func @transform_1(%arg0: i32) -> (i32, i32) {
    %c0_i32 = arith.constant 0 : i32
    %c0_i32_0 = arith.constant 0 : i32
    %c0_i32_1 = arith.constant 0 : i32
    return %c0_i32, %c0_i32_0 : i32, i32
  }
  func.func @transform_2(%arg0: i32) -> (i32, i32) {
    %c0_i32 = arith.constant 0 : i32
    %c0_i32_0 = arith.constant 0 : i32
    %c0_i32_1 = arith.constant 0 : i32
    return %c0_i32, %c0_i32_0 : i32, i32
  }
  func.func @transform_3(%arg0: i32) -> (i32, i32) {
    %c0_i32 = arith.constant 0 : i32
    %c0_i32_0 = arith.constant 0 : i32
    %c0_i32_1 = arith.constant 0 : i32
    return %c0_i32, %c0_i32_0 : i32, i32
  }
  func.func @transform_4(%arg0: i32) -> (i32, i32) {
    %c0_i32 = arith.constant 0 : i32
    %c0_i32_0 = arith.constant 0 : i32
    %c0_i32_1 = arith.constant 0 : i32
    return %c0_i32, %c0_i32_0 : i32, i32
  }
  func.func @transform_5(%arg0: i32) -> (i32, i32) {
    %c0_i32 = arith.constant 0 : i32
    %c0_i32_0 = arith.constant 0 : i32
    return %arg0, %c0_i32 : i32, i32
  }
}

</mosaic_0001>

<bundles_post_ra>
// kernel: decoder_forward.1
= control target key start
LH: loop header
LB: loop body
LE: loop exit
PB: predicated region body
PF: predicated region fallthrough
CT: control target
= control target key end

     0   :  { %10 = vsyncpa [#allocation3], 0  ;;  %s2955_s0 = inlined_call_operand.hbm [shape: f32[8,32], index: 0, kind: input, shape index: {}]   ;;  %s2956_s1 = inlined_call_operand.hbm [shape: bf16[32,512], index: 1, kind: input, shape index: {}]   ;;  %s2957_s2 = inlined_call_operand.hbm [shape: f32[1,512], index: 2, kind: input, shape index: {}]   ;;  %s2958_s3 = inlined_call_operand.hbm [shape: bf16[512,896], index: 3, kind: input, shape index: {}]   ;;  %s2959_s4 = inlined_call_operand.vmem [shape: f32[1,896], index: 4, kind: input, shape index: {}]   ;;  %s2960_s5 = inlined_call_operand.hbm [shape: f32[8,896], index: 5, kind: output, shape index: {}]  }
   0x1   :  { %11 = vsyncpa [#allocation6], 0 }
   0x2   :  { %12 = vsyncpa [#allocation9], 0 }
   0x3   :  { %13 = vsyncpa [#allocation4], 0  ;;  %s2839_s18 = smov [#allocation5]  }
   0x4   :  { %s29_s19 = sshll.u32 %s2839_s18, 4  ;;  %s30_s19 = int_to_ptr.vmem [resolvable:$true] %s29_s19 }
   0x5   :  { %s2739_s20 = scalar_lea.vmem %s30_s19, 1024  ;;  %p2744_p1 = scmp.lt.s32.totalorder %s30_s19, %s30_s19 }
   0x6   :  { %p2740_p0 = scmp.ne.s32.totalorder %s30_s19, %s2739_s20  ;;  %p2745_p2 = scmp.lt.s32.totalorder %s2739_s20, %s2739_s20 }
   0x8   :  { %p2746_p3 = por %p2745_p2, %p2744_p1 }
   0xa   :  { %p2747_p4 = pnand %p2746_p3, %p2740_p0 }
   0xc   :  { %2750 = shalt.err (!%p2747_p4)
}
   0xd   :  { %s2840_s21 = smov 256   ;;  %s2841_s22 = smov 16  }
   0xe   :  { %35 = dma.hbm_to_vmem [thread:$0]  %s2956_s1, 1024, %s30_s19, [#allocation6], %s2840_s21, %s2840_s21, %s2841_s22  }
   0xf   :  { %s2842_s25 = smov [#allocation2]   ;;  %s2843_s27 = smov [#allocation7]  }
  0x10   :  { %s20_s26 = sshll.u32 %s2842_s25, 4  ;;  %s42_s28 = sshll.u32 %s2843_s27, 4  ;;  %s21_s26 = int_to_ptr.vmem [resolvable:$true] %s20_s26  ;;  %s43_s28 = int_to_ptr.vmem [resolvable:$true] %s42_s28 }
  0x11   :  { %s2759_s29 = scalar_lea.vmem %s21_s26, 128  ;;  %p2764_p6 = scmp.lt.s32.totalorder %s21_s26, %s21_s26 }
  0x12   :  { %p2760_p5 = scmp.ne.s32.totalorder %s21_s26, %s2759_s29  ;;  %p2765_p7 = scmp.lt.s32.totalorder %s2759_s29, %s2759_s29 }
  0x14   :  { %p2766_p8 = por %p2765_p7, %p2764_p6 }
  0x16   :  { %p2767_p9 = pnand %p2766_p8, %p2760_p5 }
  0x18   :  { %2770 = shalt.err (!%p2767_p9)
}
  0x19   :  { %23 = dma.hbm_to_vmem [thread:$0]  %s2955_s0, 128, %s21_s26, [#allocation3]  }
  0x1a   :  { %s2779_s7 = scalar_lea.vmem %s43_s28, 64  ;;  %p2784_p11 = scmp.lt.s32.totalorder %s43_s28, %s43_s28 }
  0x1b   :  { %p2780_p10 = scmp.ne.s32.totalorder %s43_s28, %s2779_s7  ;;  %p2785_p12 = scmp.lt.s32.totalorder %s2779_s7, %s2779_s7 }
  0x1d   :  { %p2786_p13 = por %p2785_p12, %p2784_p11 }
  0x1f   :  { %p2787_p0 = pnand %p2786_p13, %p2780_p10 }
  0x21   :  { %2790 = shalt.err (!%p2787_p0)
}
  0x22   :  { %45 = dma.hbm_to_vmem [thread:$0]  %s2957_s2, 64, %s43_s28, [#allocation6]  }
  0x23   :  { %s2844_s9 = smov [#allocation8]  }
  0x24   :  { %s51_s10 = sshll.u32 %s2844_s9, 4  ;;  %s52_s10 = int_to_ptr.vmem [resolvable:$true] %s51_s10 }
  0x25   :  { %s2799_s11 = scalar_lea.vmem %s52_s10, 28672  ;;  %p2804_p2 = scmp.lt.s32.totalorder %s52_s10, %s52_s10 }
  0x26   :  { %p2800_p1 = scmp.ne.s32.totalorder %s52_s10, %s2799_s11  ;;  %p2805_p3 = scmp.lt.s32.totalorder %s2799_s11, %s2799_s11 }
  0x28   :  { %p2806_p4 = por %p2805_p3, %p2804_p2 }
  0x2a   :  { %p2807_p5 = pnand %p2806_p4, %p2800_p1 }
  0x2c   :  { %2810 = shalt.err (!%p2807_p5)
}
  0x2d   :  { %s2845_s0 = smov 448   ;;  %s2846_s12 = smov 28  }
  0x2e   :  { %57 = dma.hbm_to_vmem [thread:$0]  %s2958_s3, 28672, %s52_s10, [#allocation9], %s2845_s0, %s2845_s0, %s2846_s12  }
  0x2f   :  { %2831 = dma.done.wait [#allocation3], 128  }
  0x30   :  { %2832 = vsyncadd [#allocation3], 4294967168 }
  0x31   :  { %2833 = dma.done.wait [#allocation6], 1088  }
  0x32   :  { %2834 = vsyncadd [#allocation6], 4294966208 }
  0x33   :  { %2835 = dma.done.wait [#allocation9], 28672  }
  0x34   :  { %2836 = vsyncadd [#allocation9], 4294938624  ;;  %v2847_v0 = vmov 0   ;;  %v2371_v1 = vld [vmem:[#allocation5 + $0x24] ss:$16 sps:$4 sm:$0xff]   ;;  %v73_v9 = vld [vmem:[#allocation2] sm:$0xff] }
  0x35   :  { %181 = vmatprep.mubr.bf16.mxu0 %v2847_v0  ;;  %222 = vmatprep.mubr.bf16.mxu1 %v2847_v0  ;;  %v2373_v2 = vld [vmem:[#allocation5 + $0x2c] ss:$16 sps:$4 sm:$0xff]   ;;  %v2375_v3 = vld [vmem:[#allocation5 + $0x20] ss:$16 sps:$4 sm:$0xff]   ;;  %v2376_v4 = vld [vmem:[#allocation5 + $0x28] ss:$16 sps:$4 sm:$0xff]   ;;  %v74_v12 = vpack.c.bf16 %v73_v9, %v73_v9 }
  0x36   :  { %161 = vmatprep.subr.bf16.mxu0 %v2371_v1  ;;  %202 = vmatprep.subr.bf16.mxu1 %v2373_v2  ;;  %v2377_v5 = vld [vmem:[#allocation5 + $0x4] ss:$16 sps:$4 sm:$0xff]   ;;  %v2379_v6 = vld [vmem:[#allocation5 + $0xc] ss:$16 sps:$4 sm:$0xff]   ;;  %v2381_v7 = vld [vmem:[#allocation5] ss:$16 sps:$4 sm:$0xff]  }
  0x37   :  { %162 = vmatpush1.bf16.msra.mxu0 %v2375_v3  ;;  %203 = vmatpush1.bf16.msra.mxu1 %v2376_v4  ;;  %v2382_v8 = vld [vmem:[#allocation5 + $0x8] ss:$16 sps:$4 sm:$0xff]   ;;  %v2385_v11 = vld [vmem:[#allocation8 + $0x18c] ss:$28 sps:$4 sm:$0xff]   ;;  %vm145_vm0 = vcmask 261120  }
  0x38   :  { %163 = vmatprep.subr.bf16.mxu0 %v2377_v5  ;;  %204 = vmatprep.subr.bf16.mxu1 %v2379_v6  ;;  %v2383_v10 = vld [vmem:[#allocation8 + $0x188] ss:$28 sps:$4 sm:$0xff]   ;;  %v2391_v15 = vld [vmem:[#allocation8 + $0x154] ss:$28 sps:$4 sm:$0xff]   ;;  %v2397_v19 = vld [vmem:[#allocation8 + $0x11c] ss:$28 sps:$4 sm:$0xff]  }
  0x39   :  { %v2386_v13 = vld [vmem:[#allocation8 + $0x508] ss:$28 sps:$4 sm:$0xff]   ;;  %v2394_v16 = vld [vmem:[#allocation8 + $0x4d4] ss:$28 sps:$4 sm:$0xff]   ;;  %v2400_v20 = vld [vmem:[#allocation8 + $0x49c] ss:$28 sps:$4 sm:$0xff]  }
  0x3a   :  { %v2388_v14 = vld [vmem:[#allocation8 + $0x50c] ss:$28 sps:$4 sm:$0xff]   ;;  %v2395_v21 = vld [vmem:[#allocation8 + $0x118] ss:$28 sps:$4 sm:$0xff]   ;;  %v2403_v23 = vld [vmem:[#allocation8 + $0xe4] ss:$28 sps:$4 sm:$0xff]  }
  0x3b   :  { %164 = vmatpush1.bf16.msra.mxu0 %v2381_v7  ;;  %205 = vmatpush1.bf16.msra.mxu1 %v2382_v8  ;;  %v2389_v17 = vld [vmem:[#allocation8 + $0x150] ss:$28 sps:$4 sm:$0xff]   ;;  %v2398_v22 = vld [vmem:[#allocation8 + $0x498] ss:$28 sps:$4 sm:$0xff]   ;;  %v2406_v24 = vld [vmem:[#allocation8 + $0x464] ss:$28 sps:$4 sm:$0xff]  }
  0x3c   :  { %1684 = vmatprep.subr.bf16.mxu0 %v2385_v11  ;;  %1725 = vmatprep.subr.bf16.mxu1 %v2388_v14  ;;  %v2392_v18 = vld [vmem:[#allocation8 + $0x4d0] ss:$28 sps:$4 sm:$0xff]   ;;  %v2401_v25 = vld [vmem:[#allocation8 + $0xe0] ss:$28 sps:$4 sm:$0xff]   ;;  %v2407_v29 = vld [vmem:[#allocation8 + $0xa8] ss:$28 sps:$4 sm:$0xff]  }
  0x3d   :  { %v2404_v26 = vld [vmem:[#allocation8 + $0x460] ss:$28 sps:$4 sm:$0xff]   ;;  %v2409_v27 = vld [vmem:[#allocation8 + $0xac] ss:$28 sps:$4 sm:$0xff]   ;;  %v2415_v31 = vld [vmem:[#allocation8 + $0x74] ss:$28 sps:$4 sm:$0xff]  }
  0x3e   :  { %2084 = vmatmul.mubr.msk.bf16.vlgmr.msra.gmra.mxu0 %vm145_vm0, %v74_v12  ;;  %2085 = vmatmul.mubr.msk.bf16.vlgmr.msra.gmra.mxu1 %vm145_vm0, %v74_v12  ;;  %v2412_v28 = vld [vmem:[#allocation8 + $0x42c] ss:$28 sps:$4 sm:$0xff]   ;;  %v2418_v32 = vld [vmem:[#allocation8 + $0x3f4] ss:$28 sps:$4 sm:$0xff]   ;;  %v2421_v35 = vld [vmem:[#allocation8 + $0x3c] ss:$28 sps:$4 sm:$0xff]  }
  0x3f   :  { %1685 = vmatpush1.bf16.msra.mxu0 %v2383_v10  ;;  %1726 = vmatpush1.bf16.msra.mxu1 %v2386_v13  ;;  %v2410_v30 = vld [vmem:[#allocation8 + $0x428] ss:$28 sps:$4 sm:$0xff]   ;;  %v2413_v33 = vld [vmem:[#allocation8 + $0x70] ss:$28 sps:$4 sm:$0xff]   ;;  %v2424_v36 = vld [vmem:[#allocation8 + $0x3bc] ss:$28 sps:$4 sm:$0xff]   ;;  %v85_v13 = vlaneseq }
  0x40   :  { %1686 = vmatprep.subr.bf16.mxu0 %v2391_v15  ;;  %1727 = vmatprep.subr.bf16.mxu1 %v2394_v16  ;;  %v2416_v34 = vld [vmem:[#allocation8 + $0x3f0] ss:$28 sps:$4 sm:$0xff]   ;;  %v2419_v37 = vld [vmem:[#allocation8 + $0x38] ss:$28 sps:$4 sm:$0xff]   ;;  %v2427_v39 = vld [vmem:[#allocation8 + $0x4] ss:$28 sps:$4 sm:$0xff]  }
  0x41   :  { %v2422_v38 = vld [vmem:[#allocation8 + $0x3b8] ss:$28 sps:$4 sm:$0xff]   ;;  %v2430_v40 = vld [vmem:[#allocation8 + $0x384] ss:$28 sps:$4 sm:$0xff]   ;;  %v2433_v43 = vld [vmem:[#allocation8 + $0x34c] ss:$28 sps:$4 sm:$0xff]  }
  0x42   :  { %v2425_v41 = vld [vmem:[#allocation8] ss:$28 sps:$4 sm:$0xff]   ;;  %v2436_v44 = vld [vmem:[#allocation8 + $0x6cc] ss:$28 sps:$4 sm:$0xff]   ;;  %v2439_v47 = vld [vmem:[#allocation8 + $0x314] ss:$28 sps:$4 sm:$0xff]  }
  0x43   :  { %1687 = vmatpush1.bf16.msra.mxu0 %v2389_v17  ;;  %1728 = vmatpush1.bf16.msra.mxu1 %v2392_v18  ;;  %v2428_v42 = vld [vmem:[#allocation8 + $0x380] ss:$28 sps:$4 sm:$0xff]   ;;  %v2431_v45 = vld [vmem:[#allocation8 + $0x348] ss:$28 sps:$4 sm:$0xff]   ;;  %v2442_v48 = vld [vmem:[#allocation8 + $0x694] ss:$28 sps:$4 sm:$0xff]  }
  0x44   :  { %1688 = vmatprep.subr.bf16.mxu0 %v2397_v19  ;;  %1729 = vmatprep.subr.bf16.mxu1 %v2400_v20  ;;  %v2434_v46 = vld [vmem:[#allocation8 + $0x6c8] ss:$28 sps:$4 sm:$0xff]   ;;  %v2437_v49 = vld [vmem:[#allocation8 + $0x310] ss:$28 sps:$4 sm:$0xff]   ;;  %v2445_v51 = vld [vmem:[#allocation8 + $0x2dc] ss:$28 sps:$4 sm:$0xff]  }
  0x45   :  { %v2440_v50 = vld [vmem:[#allocation8 + $0x690] ss:$28 sps:$4 sm:$0xff]   ;;  %v2448_v52 = vld [vmem:[#allocation8 + $0x65c] ss:$28 sps:$4 sm:$0xff]   ;;  %v2451_v55 = vld [vmem:[#allocation8 + $0x2a4] ss:$28 sps:$4 sm:$0xff]  }
  0x46   :  { %v2443_v53 = vld [vmem:[#allocation8 + $0x2d8] ss:$28 sps:$4 sm:$0xff]   ;;  %v2454_v56 = vld [vmem:[#allocation8 + $0x624] ss:$28 sps:$4 sm:$0xff]   ;;  %v2457_v59 = vld [vmem:[#allocation8 + $0x26c] ss:$28 sps:$4 sm:$0xff]  }
  0x47   :  { %1689 = vmatpush1.bf16.msra.mxu0 %v2395_v21  ;;  %1730 = vmatpush1.bf16.msra.mxu1 %v2398_v22  ;;  %v2446_v54 = vld [vmem:[#allocation8 + $0x658] ss:$28 sps:$4 sm:$0xff]   ;;  %v2449_v57 = vld [vmem:[#allocation8 + $0x2a0] ss:$28 sps:$4 sm:$0xff]   ;;  %v2460_v60 = vld [vmem:[#allocation8 + $0x5ec] ss:$28 sps:$4 sm:$0xff]  }
  0x48   :  { %1690 = vmatprep.subr.bf16.mxu0 %v2403_v23  ;;  %1731 = vmatprep.subr.bf16.mxu1 %v2406_v24  ;;  %v2452_v58 = vld [vmem:[#allocation8 + $0x620] ss:$28 sps:$4 sm:$0xff]   ;;  %v2455_v61 = vld [vmem:[#allocation8 + $0x268] ss:$28 sps:$4 sm:$0xff]   ;;  %v2463_v63 = vld [vmem:[#allocation8 + $0x234] ss:$28 sps:$4 sm:$0xff]  }
  0x49   :  { %v2458_v62 = vld [vmem:[#allocation8 + $0x5e8] ss:$28 sps:$4 sm:$0xff]   ;;  %v2466_v0 = vld [vmem:[#allocation8 + $0x5b4] ss:$28 sps:$4 sm:$0xff]   ;;  %v2469_v3 = vld [vmem:[#allocation8 + $0x1fc] ss:$28 sps:$4 sm:$0xff]  }
  0x4a   :  { %v2461_v1 = vld [vmem:[#allocation8 + $0x230] ss:$28 sps:$4 sm:$0xff]   ;;  %v2472_v4 = vld [vmem:[#allocation8 + $0x57c] ss:$28 sps:$4 sm:$0xff]   ;;  %v2475_v7 = vld [vmem:[#allocation8 + $0x1c4] ss:$28 sps:$4 sm:$0xff]  }
  0x4b   :  { %1691 = vmatpush1.bf16.msra.mxu0 %v2401_v25  ;;  %1732 = vmatpush1.bf16.msra.mxu1 %v2404_v26  ;;  %v2464_v2 = vld [vmem:[#allocation8 + $0x5b0] ss:$28 sps:$4 sm:$0xff]   ;;  %v2467_v5 = vld [vmem:[#allocation8 + $0x1f8] ss:$28 sps:$4 sm:$0xff]   ;;  %v2478_v8 = vld [vmem:[#allocation8 + $0x544] ss:$28 sps:$4 sm:$0xff]  }
  0x4c   :  { %1692 = vmatprep.subr.bf16.mxu0 %v2409_v27  ;;  %1733 = vmatprep.subr.bf16.mxu1 %v2412_v28  ;;  %v2470_v6 = vld [vmem:[#allocation8 + $0x578] ss:$28 sps:$4 sm:$0xff]   ;;  %v2473_v9 = vld [vmem:[#allocation8 + $0x1c0] ss:$28 sps:$4 sm:$0xff]   ;;  %v2891_v14 = vshrl.u32 %v85_v13, 7 }
  0x4d   :  { %v2476_v10 = vld [vmem:[#allocation8 + $0x540] ss:$28 sps:$4 sm:$0xff]   ;;  %v2481_v11 = vld [vmem:[#allocation8 + $0x194] ss:$28 sps:$4 sm:$0xff]  }
  0x4e   :  { %v2484_v12 = vld [vmem:[#allocation8 + $0x514] ss:$28 sps:$4 sm:$0xff]   ;;  %v87_v15 = vsub.s32 0, %v2891_v14  ;;  %v95_v16 = vsub.s32 2, %v2891_v14  ;;  %v83_v17 = vld [vmem:[#allocation7] sm:$0xf] }
  0x4f   :  { %1693 = vmatpush1.bf16.msra.mxu0 %v2407_v29  ;;  %1734 = vmatpush1.bf16.msra.mxu1 %v2410_v30  ;;  %v91_v18 = vsub.s32 1, %v2891_v14  ;;  %v99_v19 = vsub.s32 3, %v2891_v14  ;;  %v2530_v13 = vld [vmem:[#allocation8 + $0x6d0] ss:$28 sps:$4 sm:$0xff]  }
  0x50   :  { %1694 = vmatprep.subr.bf16.mxu0 %v2415_v31  ;;  %1735 = vmatprep.subr.bf16.mxu1 %v2418_v32  ;;  %v88_v20 = vrot.slane %v83_v17, %v87_v15  ;;  %v96_v21 = vrot.slane %v83_v17, %v95_v16 }
  0x51   :  { %v92_v22 = vrot.slane %v83_v17, %v91_v18  ;;  %v100_v23 = vrot.slane %v83_v17, %v99_v19  ;;  %v2535_v17 = vld [vmem:[#allocation8 + $0x31c] ss:$28 sps:$4 sm:$0xff]  }
  0x53   :  { %1695 = vmatpush1.bf16.msra.mxu0 %v2413_v33  ;;  %1736 = vmatpush1.bf16.msra.mxu1 %v2416_v34 }
  0x54   :  { %1696 = vmatprep.subr.bf16.mxu0 %v2421_v35  ;;  %1737 = vmatprep.subr.bf16.mxu1 %v2424_v36 }
  0x57   :  { %1697 = vmatpush1.bf16.msra.mxu0 %v2419_v37  ;;  %1738 = vmatpush1.bf16.msra.mxu1 %v2422_v38 }
  0x58   :  { %1698 = vmatprep.subr.bf16.mxu0 %v2427_v39  ;;  %1739 = vmatprep.subr.bf16.mxu1 %v2430_v40 }
  0x5b   :  { %1699 = vmatpush1.bf16.msra.mxu0 %v2425_v41  ;;  %1740 = vmatpush1.bf16.msra.mxu1 %v2428_v42 }
  0x5c   :  { %1700 = vmatprep.subr.bf16.mxu0 %v2433_v43  ;;  %1741 = vmatprep.subr.bf16.mxu1 %v2436_v44  ;;  %v2479_v43 = vld [vmem:[#allocation8 + $0x190] ss:$28 sps:$4 sm:$0xff]  }
  0x5d   :  { %v2482_v44 = vld [vmem:[#allocation8 + $0x510] ss:$28 sps:$4 sm:$0xff]  }
  0x5f   :  { %1701 = vmatpush2.bf16.msra.mxu0 %v2431_v45  ;;  %1742 = vmatpush2.bf16.msra.mxu1 %v2434_v46  ;;  %v2487_v46 = vld [vmem:[#allocation8 + $0x15c] ss:$28 sps:$4 sm:$0xff]  }
  0x60   :  { %1702 = vmatprep.subr.bf16.mxu0 %v2439_v47  ;;  %1743 = vmatprep.subr.bf16.mxu1 %v2442_v48  ;;  %v2490_v47 = vld [vmem:[#allocation8 + $0x4dc] ss:$28 sps:$4 sm:$0xff]  }
  0x61   :  { %v2485_v48 = vld [vmem:[#allocation8 + $0x158] ss:$28 sps:$4 sm:$0xff]  }
  0x63   :  { %1703 = vmatpush2.bf16.msra.mxu0 %v2437_v49  ;;  %1744 = vmatpush2.bf16.msra.mxu1 %v2440_v50  ;;  %v2488_v49 = vld [vmem:[#allocation8 + $0x4d8] ss:$28 sps:$4 sm:$0xff]   ;;  %v2493_v50 = vld [vmem:[#allocation8 + $0x124] ss:$28 sps:$4 sm:$0xff]  }
  0x64   :  { %1704 = vmatprep.subr.bf16.mxu0 %v2445_v51  ;;  %1745 = vmatprep.subr.bf16.mxu1 %v2448_v52  ;;  %v2496_v51 = vld [vmem:[#allocation8 + $0x4a4] ss:$28 sps:$4 sm:$0xff]  }
  0x65   :  { %v2491_v52 = vld [vmem:[#allocation8 + $0x120] ss:$28 sps:$4 sm:$0xff]  }
  0x67   :  { %1705 = vmatpush2.bf16.msra.mxu0 %v2443_v53  ;;  %1746 = vmatpush2.bf16.msra.mxu1 %v2446_v54  ;;  %v2494_v53 = vld [vmem:[#allocation8 + $0x4a0] ss:$28 sps:$4 sm:$0xff]   ;;  %v2499_v54 = vld [vmem:[#allocation8 + $0xec] ss:$28 sps:$4 sm:$0xff]  }
  0x68   :  { %1706 = vmatprep.subr.bf16.mxu0 %v2451_v55  ;;  %1747 = vmatprep.subr.bf16.mxu1 %v2454_v56  ;;  %v2502_v55 = vld [vmem:[#allocation8 + $0x46c] ss:$28 sps:$4 sm:$0xff]  }
  0x69   :  { %v2497_v56 = vld [vmem:[#allocation8 + $0xe8] ss:$28 sps:$4 sm:$0xff]  }
  0x6b   :  { %1707 = vmatpush2.bf16.msra.mxu0 %v2449_v57  ;;  %1748 = vmatpush2.bf16.msra.mxu1 %v2452_v58  ;;  %v2500_v57 = vld [vmem:[#allocation8 + $0x468] ss:$28 sps:$4 sm:$0xff]   ;;  %v2505_v58 = vld [vmem:[#allocation8 + $0xb4] ss:$28 sps:$4 sm:$0xff]  }
  0x6c   :  { %1708 = vmatprep.subr.bf16.mxu0 %v2457_v59  ;;  %1749 = vmatprep.subr.bf16.mxu1 %v2460_v60  ;;  %v2508_v59 = vld [vmem:[#allocation8 + $0x434] ss:$28 sps:$4 sm:$0xff]  }
  0x6d   :  { %v2503_v60 = vld [vmem:[#allocation8 + $0xb0] ss:$28 sps:$4 sm:$0xff]  }
  0x6f   :  { %1709 = vmatpush2.bf16.msra.mxu0 %v2455_v61  ;;  %1750 = vmatpush2.bf16.msra.mxu1 %v2458_v62  ;;  %v2506_v61 = vld [vmem:[#allocation8 + $0x430] ss:$28 sps:$4 sm:$0xff]   ;;  %v2511_v62 = vld [vmem:[#allocation8 + $0x7c] ss:$28 sps:$4 sm:$0xff]  }
  0x70   :  { %1710 = vmatprep.subr.bf16.mxu0 %v2463_v63  ;;  %1751 = vmatprep.subr.bf16.mxu1 %v2466_v0  ;;  %v2514_v63 = vld [vmem:[#allocation8 + $0x3fc] ss:$28 sps:$4 sm:$0xff]  }
  0x71   :  { %v2509_v0 = vld [vmem:[#allocation8 + $0x78] ss:$28 sps:$4 sm:$0xff]  }
  0x73   :  { %1711 = vmatpush2.bf16.msra.mxu0 %v2461_v1  ;;  %1752 = vmatpush2.bf16.msra.mxu1 %v2464_v2  ;;  %v2512_v1 = vld [vmem:[#allocation8 + $0x3f8] ss:$28 sps:$4 sm:$0xff]   ;;  %v2517_v2 = vld [vmem:[#allocation8 + $0x44] ss:$28 sps:$4 sm:$0xff]  }
  0x74   :  { %1712 = vmatprep.subr.bf16.mxu0 %v2469_v3  ;;  %1753 = vmatprep.subr.bf16.mxu1 %v2472_v4  ;;  %v2520_v3 = vld [vmem:[#allocation8 + $0x3c4] ss:$28 sps:$4 sm:$0xff]  }
  0x75   :  { %v2515_v4 = vld [vmem:[#allocation8 + $0x40] ss:$28 sps:$4 sm:$0xff]  }
  0x77   :  { %1713 = vmatpush2.bf16.msra.mxu0 %v2467_v5  ;;  %1754 = vmatpush2.bf16.msra.mxu1 %v2470_v6  ;;  %v2518_v5 = vld [vmem:[#allocation8 + $0x3c0] ss:$28 sps:$4 sm:$0xff]   ;;  %v2523_v6 = vld [vmem:[#allocation8 + $0xc] ss:$28 sps:$4 sm:$0xff]  }
  0x78   :  { %1714 = vmatprep.subr.bf16.mxu0 %v2475_v7  ;;  %1755 = vmatprep.subr.bf16.mxu1 %v2478_v8  ;;  %v2526_v7 = vld [vmem:[#allocation8 + $0x38c] ss:$28 sps:$4 sm:$0xff]  }
  0x79   :  { %v2521_v8 = vld [vmem:[#allocation8 + $0x8] ss:$28 sps:$4 sm:$0xff]  }
  0x7b   :  { %1715 = vmatpush2.bf16.msra.mxu0 %v2473_v9  ;;  %1756 = vmatpush2.bf16.msra.mxu1 %v2476_v10  ;;  %v2524_v9 = vld [vmem:[#allocation8 + $0x388] ss:$28 sps:$4 sm:$0xff]   ;;  %v2529_v10 = vld [vmem:[#allocation8 + $0x354] ss:$28 sps:$4 sm:$0xff]  }
  0x7c   :  { %1766 = vmatprep.subr.bf16.mxu0 %v2481_v11  ;;  %1807 = vmatprep.subr.bf16.mxu1 %v2484_v12  ;;  %v2532_v11 = vld [vmem:[#allocation8 + $0x6d4] ss:$28 sps:$4 sm:$0xff]  }
  0x7d   :  { %v2527_v12 = vld [vmem:[#allocation8 + $0x350] ss:$28 sps:$4 sm:$0xff]  }
  0xfe   :  { %v183_v24 = vpop.f32.mrf.mxu0  ;;  %v224_v25 = vpop.f32.mrf.mxu1 }
  0xff   :  { %v184_v26 = vadd.f32 %v183_v24, %v88_v20  ;;  %v225_v27 = vadd.f32 %v224_v25, %v96_v21  ;;  %v2538_v20 = vld [vmem:[#allocation8 + $0x69c] ss:$28 sps:$4 sm:$0xff]   ;;  %v2544_v24 = vld [vmem:[#allocation8 + $0x664] ss:$28 sps:$4 sm:$0xff]  }
 0x100   :  { %v185_v28 = vpop.f32.mrf.mxu0  ;;  %v226_v29 = vpop.f32.mrf.mxu1  ;;  %v2533_v21 = vld [vmem:[#allocation8 + $0x318] ss:$28 sps:$4 sm:$0xff]   ;;  %v2539_v25 = vld [vmem:[#allocation8 + $0x2e0] ss:$28 sps:$4 sm:$0xff]  }
 0x101   :  { %v233_v30 = vmax.f32 %v225_v27, 0.0  ;;  %v186_v31 = vadd.f32 %v185_v28, %v92_v22  ;;  %v227_v32 = vadd.f32 %v226_v29, %v100_v23  ;;  %v231_v33 = vmax.f32 %v184_v26, 0.0  ;;  %v2536_v22 = vld [vmem:[#allocation8 + $0x698] ss:$28 sps:$4 sm:$0xff]   ;;  %v2541_v23 = vld [vmem:[#allocation8 + $0x2e4] ss:$28 sps:$4 sm:$0xff]  }
 0x102   :  { %v187_v34 = vpop.f32.mrf.mxu0  ;;  %v228_v35 = vpop.f32.mrf.mxu1  ;;  %v2542_v26 = vld [vmem:[#allocation8 + $0x660] ss:$28 sps:$4 sm:$0xff]   ;;  %v2547_v27 = vld [vmem:[#allocation8 + $0x2ac] ss:$28 sps:$4 sm:$0xff]  }
 0x103   :  { %v232_v36 = vmax.f32 %v186_v31, 0.0  ;;  %v234_v37 = vmax.f32 %v227_v32, 0.0  ;;  %v2905_v38 = vpack.c.bf16 %v233_v30, %v233_v30  ;;  %v2911_v45 = vpack.c.bf16 %v231_v33, %v231_v33  ;;  %v2550_v28 = vld [vmem:[#allocation8 + $0x62c] ss:$28 sps:$4 sm:$0xff]   ;;  %v2553_v31 = vld [vmem:[#allocation8 + $0x274] ss:$28 sps:$4 sm:$0xff]  }
 0x104   :  { %v188_v39 = vpop.f32.mrf.mxu0  ;;  %v229_v40 = vpop.f32.mrf.mxu1  ;;  %v2545_v29 = vld [vmem:[#allocation8 + $0x2a8] ss:$28 sps:$4 sm:$0xff]   ;;  %v2556_v32 = vld [vmem:[#allocation8 + $0x5f4] ss:$28 sps:$4 sm:$0xff]   ;;  %v2559_v35 = vld [vmem:[#allocation8 + $0x23c] ss:$28 sps:$4 sm:$0xff]  }
 0x105   :  { %v2907_v41 = vpack.c.bf16 %v232_v36, %v232_v36  ;;  %v2909_v42 = vpack.c.bf16 %v234_v37, %v234_v37  ;;  %v2548_v30 = vld [vmem:[#allocation8 + $0x628] ss:$28 sps:$4 sm:$0xff]   ;;  %v2551_v33 = vld [vmem:[#allocation8 + $0x270] ss:$28 sps:$4 sm:$0xff]   ;;  %v2562_v36 = vld [vmem:[#allocation8 + $0x5bc] ss:$28 sps:$4 sm:$0xff]  }
 0x106   :  { %v2554_v34 = vld [vmem:[#allocation8 + $0x5f0] ss:$28 sps:$4 sm:$0xff]   ;;  %v2557_v37 = vld [vmem:[#allocation8 + $0x238] ss:$28 sps:$4 sm:$0xff]   ;;  %v2565_v40 = vld [vmem:[#allocation8 + $0x204] ss:$28 sps:$4 sm:$0xff]  }
 0x107   :  { %1716 = vmatprep.mubr.bf16.mxu0 %v2907_v41  ;;  %1757 = vmatprep.mubr.bf16.mxu1 %v2909_v42  ;;  %v2560_v39 = vld [vmem:[#allocation8 + $0x5b8] ss:$28 sps:$4 sm:$0xff]  }
 0x108   :  { %1717 = vmatmul.mubr.bf16.vlgmr.msra.gmra.mxu0 %v2911_v45  ;;  %1758 = vmatmul.mubr.bf16.vlgmr.msra.gmra.mxu1 %v2905_v38 }
 0x109   :  { %1767 = vmatpush1.bf16.msra.mxu0 %v2479_v43  ;;  %1808 = vmatpush1.bf16.msra.mxu1 %v2482_v44  ;;  %v2568_v43 = vld [vmem:[#allocation8 + $0x584] ss:$28 sps:$4 sm:$0xff]  }
 0x10a   :  { %1798 = vmatprep.mubr.bf16.mxu0 %v2907_v41  ;;  %1839 = vmatprep.mubr.bf16.mxu1 %v2909_v42  ;;  %v2563_v44 = vld [vmem:[#allocation8 + $0x200] ss:$28 sps:$4 sm:$0xff]  }
 0x10b   :  { %1768 = vmatprep.subr.bf16.mxu0 %v2487_v46  ;;  %1809 = vmatprep.subr.bf16.mxu1 %v2490_v47  ;;  %v2566_v46 = vld [vmem:[#allocation8 + $0x580] ss:$28 sps:$4 sm:$0xff]   ;;  %v2571_v47 = vld [vmem:[#allocation8 + $0x1cc] ss:$28 sps:$4 sm:$0xff]  }
 0x10d   :  { %1769 = vmatpush1.bf16.msra.mxu0 %v2485_v48  ;;  %1810 = vmatpush1.bf16.msra.mxu1 %v2488_v49  ;;  %v2574_v48 = vld [vmem:[#allocation8 + $0x54c] ss:$28 sps:$4 sm:$0xff]  }
 0x10e   :  { %1770 = vmatprep.subr.bf16.mxu0 %v2493_v50  ;;  %1811 = vmatprep.subr.bf16.mxu1 %v2496_v51  ;;  %v2569_v49 = vld [vmem:[#allocation8 + $0x1c8] ss:$28 sps:$4 sm:$0xff]   ;;  %v2577_v51 = vld [vmem:[#allocation8 + $0x19c] ss:$28 sps:$4 sm:$0xff]  }
 0x10f   :  { %v2572_v50 = vld [vmem:[#allocation8 + $0x548] ss:$28 sps:$4 sm:$0xff]  }
 0x111   :  { %1771 = vmatpush1.bf16.msra.mxu0 %v2491_v52  ;;  %1812 = vmatpush1.bf16.msra.mxu1 %v2494_v53  ;;  %v2580_v52 = vld [vmem:[#allocation8 + $0x51c] ss:$28 sps:$4 sm:$0xff]  }
 0x112   :  { %1772 = vmatprep.subr.bf16.mxu0 %v2499_v54  ;;  %1813 = vmatprep.subr.bf16.mxu1 %v2502_v55  ;;  %v2575_v53 = vld [vmem:[#allocation8 + $0x198] ss:$28 sps:$4 sm:$0xff]   ;;  %v2583_v55 = vld [vmem:[#allocation8 + $0x164] ss:$28 sps:$4 sm:$0xff]  }
 0x113   :  { %v2578_v54 = vld [vmem:[#allocation8 + $0x518] ss:$28 sps:$4 sm:$0xff]  }
 0x115   :  { %1773 = vmatpush1.bf16.msra.mxu0 %v2497_v56  ;;  %1814 = vmatpush1.bf16.msra.mxu1 %v2500_v57  ;;  %v2586_v56 = vld [vmem:[#allocation8 + $0x4e4] ss:$28 sps:$4 sm:$0xff]  }
 0x116   :  { %1774 = vmatprep.subr.bf16.mxu0 %v2505_v58  ;;  %1815 = vmatprep.subr.bf16.mxu1 %v2508_v59  ;;  %v2581_v57 = vld [vmem:[#allocation8 + $0x160] ss:$28 sps:$4 sm:$0xff]   ;;  %v2589_v59 = vld [vmem:[#allocation8 + $0x12c] ss:$28 sps:$4 sm:$0xff]  }
 0x117   :  { %v2584_v58 = vld [vmem:[#allocation8 + $0x4e0] ss:$28 sps:$4 sm:$0xff]  }
 0x119   :  { %1775 = vmatpush1.bf16.msra.mxu0 %v2503_v60  ;;  %1816 = vmatpush1.bf16.msra.mxu1 %v2506_v61  ;;  %v2592_v60 = vld [vmem:[#allocation8 + $0x4ac] ss:$28 sps:$4 sm:$0xff]  }
 0x11a   :  { %1776 = vmatprep.subr.bf16.mxu0 %v2511_v62  ;;  %1817 = vmatprep.subr.bf16.mxu1 %v2514_v63  ;;  %v2587_v61 = vld [vmem:[#allocation8 + $0x128] ss:$28 sps:$4 sm:$0xff]   ;;  %v2595_v63 = vld [vmem:[#allocation8 + $0xf4] ss:$28 sps:$4 sm:$0xff]  }
 0x11b   :  { %v2590_v62 = vld [vmem:[#allocation8 + $0x4a8] ss:$28 sps:$4 sm:$0xff]  }
 0x11d   :  { %1777 = vmatpush1.bf16.msra.mxu0 %v2509_v0  ;;  %1818 = vmatpush1.bf16.msra.mxu1 %v2512_v1  ;;  %v2598_v0 = vld [vmem:[#allocation8 + $0x474] ss:$28 sps:$4 sm:$0xff]  }
 0x11e   :  { %1778 = vmatprep.subr.bf16.mxu0 %v2517_v2  ;;  %1819 = vmatprep.subr.bf16.mxu1 %v2520_v3  ;;  %v2593_v1 = vld [vmem:[#allocation8 + $0xf0] ss:$28 sps:$4 sm:$0xff]   ;;  %v2601_v3 = vld [vmem:[#allocation8 + $0xbc] ss:$28 sps:$4 sm:$0xff]  }
 0x11f   :  { %v2596_v2 = vld [vmem:[#allocation8 + $0x470] ss:$28 sps:$4 sm:$0xff]  }
 0x121   :  { %1779 = vmatpush1.bf16.msra.mxu0 %v2515_v4  ;;  %1820 = vmatpush1.bf16.msra.mxu1 %v2518_v5  ;;  %v2604_v4 = vld [vmem:[#allocation8 + $0x43c] ss:$28 sps:$4 sm:$0xff]  }
 0x122   :  { %1780 = vmatprep.subr.bf16.mxu0 %v2523_v6  ;;  %1821 = vmatprep.subr.bf16.mxu1 %v2526_v7  ;;  %v2599_v5 = vld [vmem:[#allocation8 + $0xb8] ss:$28 sps:$4 sm:$0xff]   ;;  %v2607_v7 = vld [vmem:[#allocation8 + $0x84] ss:$28 sps:$4 sm:$0xff]  }
 0x123   :  { %v2602_v6 = vld [vmem:[#allocation8 + $0x438] ss:$28 sps:$4 sm:$0xff]  }
 0x125   :  { %1781 = vmatpush1.bf16.msra.mxu0 %v2521_v8  ;;  %1822 = vmatpush1.bf16.msra.mxu1 %v2524_v9  ;;  %v2610_v8 = vld [vmem:[#allocation8 + $0x404] ss:$28 sps:$4 sm:$0xff]  }
 0x126   :  { %1782 = vmatprep.subr.bf16.mxu0 %v2529_v10  ;;  %1823 = vmatprep.subr.bf16.mxu1 %v2532_v11  ;;  %v2605_v9 = vld [vmem:[#allocation8 + $0x80] ss:$28 sps:$4 sm:$0xff]   ;;  %v2613_v11 = vld [vmem:[#allocation8 + $0x4c] ss:$28 sps:$4 sm:$0xff]  }
 0x127   :  { %v2608_v10 = vld [vmem:[#allocation8 + $0x400] ss:$28 sps:$4 sm:$0xff]  }
 0x129   :  { %1783 = vmatpush2.bf16.msra.mxu0 %v2527_v12  ;;  %1824 = vmatpush2.bf16.msra.mxu1 %v2530_v13  ;;  %v2616_v12 = vld [vmem:[#allocation8 + $0x3cc] ss:$28 sps:$4 sm:$0xff]  }
 0x12a   :  { %1784 = vmatprep.subr.bf16.mxu0 %v2535_v17  ;;  %1825 = vmatprep.subr.bf16.mxu1 %v2538_v20  ;;  %v2611_v13 = vld [vmem:[#allocation8 + $0x48] ss:$28 sps:$4 sm:$0xff]   ;;  %v2619_v20 = vld [vmem:[#allocation8 + $0x14] ss:$28 sps:$4 sm:$0xff]  }
 0x12b   :  { %v2614_v17 = vld [vmem:[#allocation8 + $0x3c8] ss:$28 sps:$4 sm:$0xff]  }
 0x12d   :  { %1785 = vmatpush2.bf16.msra.mxu0 %v2533_v21  ;;  %1826 = vmatpush2.bf16.msra.mxu1 %v2536_v22  ;;  %v2622_v21 = vld [vmem:[#allocation8 + $0x394] ss:$28 sps:$4 sm:$0xff]  }
 0x12e   :  { %1786 = vmatprep.subr.bf16.mxu0 %v2541_v23  ;;  %1827 = vmatprep.subr.bf16.mxu1 %v2544_v24  ;;  %v2617_v22 = vld [vmem:[#allocation8 + $0x10] ss:$28 sps:$4 sm:$0xff]   ;;  %v2625_v24 = vld [vmem:[#allocation8 + $0x35c] ss:$28 sps:$4 sm:$0xff]  }
 0x12f   :  { %v2620_v23 = vld [vmem:[#allocation8 + $0x390] ss:$28 sps:$4 sm:$0xff]  }
 0x131   :  { %1787 = vmatpush2.bf16.msra.mxu0 %v2539_v25  ;;  %1828 = vmatpush2.bf16.msra.mxu1 %v2542_v26  ;;  %v2628_v25 = vld [vmem:[#allocation8 + $0x6dc] ss:$28 sps:$4 sm:$0xff]  }
 0x132   :  { %1788 = vmatprep.subr.bf16.mxu0 %v2547_v27  ;;  %1829 = vmatprep.subr.bf16.mxu1 %v2550_v28  ;;  %v2623_v26 = vld [vmem:[#allocation8 + $0x358] ss:$28 sps:$4 sm:$0xff]   ;;  %v2631_v28 = vld [vmem:[#allocation8 + $0x324] ss:$28 sps:$4 sm:$0xff]  }
 0x133   :  { %v2626_v27 = vld [vmem:[#allocation8 + $0x6d8] ss:$28 sps:$4 sm:$0xff]  }
 0x135   :  { %1789 = vmatpush2.bf16.msra.mxu0 %v2545_v29  ;;  %1830 = vmatpush2.bf16.msra.mxu1 %v2548_v30  ;;  %v2634_v29 = vld [vmem:[#allocation8 + $0x6a4] ss:$28 sps:$4 sm:$0xff]  }
 0x136   :  { %1790 = vmatprep.subr.bf16.mxu0 %v2553_v31  ;;  %1831 = vmatprep.subr.bf16.mxu1 %v2556_v32  ;;  %v2629_v30 = vld [vmem:[#allocation8 + $0x320] ss:$28 sps:$4 sm:$0xff]   ;;  %v2637_v32 = vld [vmem:[#allocation8 + $0x2ec] ss:$28 sps:$4 sm:$0xff]  }
 0x137   :  { %v2632_v31 = vld [vmem:[#allocation8 + $0x6a0] ss:$28 sps:$4 sm:$0xff]  }
 0x139   :  { %1791 = vmatpush2.bf16.msra.mxu0 %v2551_v33  ;;  %1832 = vmatpush2.bf16.msra.mxu1 %v2554_v34  ;;  %v2640_v33 = vld [vmem:[#allocation8 + $0x66c] ss:$28 sps:$4 sm:$0xff]  }
 0x13a   :  { %1792 = vmatprep.subr.bf16.mxu0 %v2559_v35  ;;  %1833 = vmatprep.subr.bf16.mxu1 %v2562_v36  ;;  %v2635_v34 = vld [vmem:[#allocation8 + $0x2e8] ss:$28 sps:$4 sm:$0xff]   ;;  %v2643_v36 = vld [vmem:[#allocation8 + $0x2b4] ss:$28 sps:$4 sm:$0xff]  }
 0x13b   :  { %v2638_v35 = vld [vmem:[#allocation8 + $0x668] ss:$28 sps:$4 sm:$0xff]  }
 0x13d   :  { %1793 = vmatpush2.bf16.msra.mxu0 %v2557_v37  ;;  %1834 = vmatpush2.bf16.msra.mxu1 %v2560_v39  ;;  %v2646_v37 = vld [vmem:[#allocation8 + $0x634] ss:$28 sps:$4 sm:$0xff]  }
 0x13e   :  { %1794 = vmatprep.subr.bf16.mxu0 %v2565_v40  ;;  %1835 = vmatprep.subr.bf16.mxu1 %v2568_v43  ;;  %v2641_v39 = vld [vmem:[#allocation8 + $0x2b0] ss:$28 sps:$4 sm:$0xff]   ;;  %v2649_v43 = vld [vmem:[#allocation8 + $0x27c] ss:$28 sps:$4 sm:$0xff]  }
 0x13f   :  { %v2644_v40 = vld [vmem:[#allocation8 + $0x630] ss:$28 sps:$4 sm:$0xff]  }
 0x141   :  { %1795 = vmatpush2.bf16.msra.mxu0 %v2563_v44  ;;  %1836 = vmatpush2.bf16.msra.mxu1 %v2566_v46  ;;  %v2652_v44 = vld [vmem:[#allocation8 + $0x5fc] ss:$28 sps:$4 sm:$0xff]  }
 0x142   :  { %1796 = vmatprep.subr.bf16.mxu0 %v2571_v47  ;;  %1837 = vmatprep.subr.bf16.mxu1 %v2574_v48  ;;  %v2647_v46 = vld [vmem:[#allocation8 + $0x278] ss:$28 sps:$4 sm:$0xff]   ;;  %v2655_v48 = vld [vmem:[#allocation8 + $0x244] ss:$28 sps:$4 sm:$0xff]  }
 0x143   :  { %v2650_v47 = vld [vmem:[#allocation8 + $0x5f8] ss:$28 sps:$4 sm:$0xff]  }
 0x145   :  { %1797 = vmatpush2.bf16.msra.mxu0 %v2569_v49  ;;  %1838 = vmatpush2.bf16.msra.mxu1 %v2572_v50  ;;  %v2658_v49 = vld [vmem:[#allocation8 + $0x5c4] ss:$28 sps:$4 sm:$0xff]  }
 0x146   :  { %1848 = vmatprep.subr.bf16.mxu0 %v2577_v51  ;;  %1889 = vmatprep.subr.bf16.mxu1 %v2580_v52  ;;  %v2653_v50 = vld [vmem:[#allocation8 + $0x240] ss:$28 sps:$4 sm:$0xff]   ;;  %v2661_v52 = vld [vmem:[#allocation8 + $0x20c] ss:$28 sps:$4 sm:$0xff]  }
 0x147   :  { %v2656_v51 = vld [vmem:[#allocation8 + $0x5c0] ss:$28 sps:$4 sm:$0xff]  }
 0x148   :  { %1799 = vmatmul.mubr.bf16.vlgmr.msra.gmra.mxu0 %v2911_v45  ;;  %1840 = vmatmul.mubr.bf16.vlgmr.msra.gmra.mxu1 %v2905_v38 }
 0x149   :  { %1849 = vmatpush1.bf16.msra.mxu0 %v2575_v53  ;;  %1880 = vmatprep.mubr.bf16.mxu0 %v2907_v41  ;;  %v2664_v53 = vld [vmem:[#allocation8 + $0x58c] ss:$28 sps:$4 sm:$0xff]  }
 0x14a   :  { %1890 = vmatpush1.bf16.msra.mxu1 %v2578_v54  ;;  %1921 = vmatprep.mubr.bf16.mxu1 %v2909_v42  ;;  %v2659_v54 = vld [vmem:[#allocation8 + $0x208] ss:$28 sps:$4 sm:$0xff]  }
 0x14b   :  { %1850 = vmatprep.subr.bf16.mxu0 %v2583_v55  ;;  %1891 = vmatprep.subr.bf16.mxu1 %v2586_v56  ;;  %v2662_v55 = vld [vmem:[#allocation8 + $0x588] ss:$28 sps:$4 sm:$0xff]   ;;  %v2667_v56 = vld [vmem:[#allocation8 + $0x1d4] ss:$28 sps:$4 sm:$0xff]  }
 0x14d   :  { %1851 = vmatpush1.bf16.msra.mxu0 %v2581_v57  ;;  %v2670_v57 = vld [vmem:[#allocation8 + $0x554] ss:$28 sps:$4 sm:$0xff]  }
 0x14e   :  { %1892 = vmatpush1.bf16.msra.mxu1 %v2584_v58  ;;  %1852 = vmatprep.subr.bf16.mxu0 %v2589_v59  ;;  %v2665_v58 = vld [vmem:[#allocation8 + $0x1d0] ss:$28 sps:$4 sm:$0xff]  }
 0x14f   :  { %1893 = vmatprep.subr.bf16.mxu1 %v2592_v60  ;;  %v2668_v59 = vld [vmem:[#allocation8 + $0x550] ss:$28 sps:$4 sm:$0xff]   ;;  %v2671_v60 = vld [vmem:[#allocation8 + $0x360] ss:$28 sps:$4 sm:$0xff]  }
 0x151   :  { %1853 = vmatpush1.bf16.msra.mxu0 %v2587_v61  ;;  %v2672_v61 = vld [vmem:[#allocation8 + $0x6e0] ss:$28 sps:$4 sm:$0xff]  }
 0x152   :  { %1894 = vmatpush1.bf16.msra.mxu1 %v2590_v62  ;;  %1854 = vmatprep.subr.bf16.mxu0 %v2595_v63  ;;  %v2673_v62 = vld [vmem:[#allocation8 + $0x1a0] ss:$28 sps:$4 sm:$0xff]  }
 0x153   :  { %1895 = vmatprep.subr.bf16.mxu1 %v2598_v0  ;;  %v2674_v63 = vld [vmem:[#allocation8 + $0x520] ss:$28 sps:$4 sm:$0xff]   ;;  %v2675_v0 = vld [vmem:[#allocation8 + $0x328] ss:$28 sps:$4 sm:$0xff]  }
 0x155   :  { %1855 = vmatpush1.bf16.msra.mxu0 %v2593_v1  ;;  %v2676_v1 = vld [vmem:[#allocation8 + $0x6a8] ss:$28 sps:$4 sm:$0xff]  }
 0x156   :  { %1896 = vmatpush1.bf16.msra.mxu1 %v2596_v2  ;;  %1856 = vmatprep.subr.bf16.mxu0 %v2601_v3  ;;  %v2677_v2 = vld [vmem:[#allocation8 + $0x168] ss:$28 sps:$4 sm:$0xff]  }
 0x157   :  { %1897 = vmatprep.subr.bf16.mxu1 %v2604_v4  ;;  %v2678_v3 = vld [vmem:[#allocation8 + $0x4e8] ss:$28 sps:$4 sm:$0xff]   ;;  %v2679_v4 = vld [vmem:[#allocation8 + $0x2f0] ss:$28 sps:$4 sm:$0xff]  }
 0x159   :  { %1857 = vmatpush1.bf16.msra.mxu0 %v2599_v5  ;;  %v2680_v5 = vld [vmem:[#allocation8 + $0x670] ss:$28 sps:$4 sm:$0xff]  }
 0x15a   :  { %1898 = vmatpush1.bf16.msra.mxu1 %v2602_v6  ;;  %1858 = vmatprep.subr.bf16.mxu0 %v2607_v7  ;;  %v2681_v6 = vld [vmem:[#allocation8 + $0x130] ss:$28 sps:$4 sm:$0xff]  }
 0x15b   :  { %1899 = vmatprep.subr.bf16.mxu1 %v2610_v8  ;;  %v2682_v7 = vld [vmem:[#allocation8 + $0x4b0] ss:$28 sps:$4 sm:$0xff]   ;;  %v2683_v8 = vld [vmem:[#allocation8 + $0x2b8] ss:$28 sps:$4 sm:$0xff]  }
 0x15d   :  { %1859 = vmatpush1.bf16.msra.mxu0 %v2605_v9  ;;  %v2684_v9 = vld [vmem:[#allocation8 + $0x638] ss:$28 sps:$4 sm:$0xff]  }
 0x15e   :  { %1900 = vmatpush1.bf16.msra.mxu1 %v2608_v10  ;;  %1860 = vmatprep.subr.bf16.mxu0 %v2613_v11  ;;  %v2685_v10 = vld [vmem:[#allocation8 + $0xf8] ss:$28 sps:$4 sm:$0xff]   ;;  %v2687_v11 = vld [vmem:[#allocation8 + $0x280] ss:$28 sps:$4 sm:$0xff]  }
 0x15f   :  { %1901 = vmatprep.subr.bf16.mxu1 %v2616_v12  ;;  %v2688_v12 = vld [vmem:[#allocation8 + $0x600] ss:$28 sps:$4 sm:$0xff]  }
 0x161   :  { %1861 = vmatpush1.bf16.msra.mxu0 %v2611_v13  ;;  %v2690_v13 = vld [vmem:[#allocation8 + $0x440] ss:$28 sps:$4 sm:$0xff]  }
 0x162   :  { %1902 = vmatpush1.bf16.msra.mxu1 %v2614_v17  ;;  %1862 = vmatprep.subr.bf16.mxu0 %v2619_v20  ;;  %v2691_v17 = vld [vmem:[#allocation8 + $0x248] ss:$28 sps:$4 sm:$0xff]  }
 0x163   :  { %1903 = vmatprep.subr.bf16.mxu1 %v2622_v21  ;;  %v2692_v20 = vld [vmem:[#allocation8 + $0x5c8] ss:$28 sps:$4 sm:$0xff]  }
 0x164   :  { %v2693_v21 = vld [vmem:[#allocation8 + $0x88] ss:$28 sps:$4 sm:$0xff]  }
 0x165   :  { %1863 = vmatpush1.bf16.msra.mxu0 %v2617_v22  ;;  %v2694_v22 = vld [vmem:[#allocation8 + $0x408] ss:$28 sps:$4 sm:$0xff]  }
 0x166   :  { %1904 = vmatpush1.bf16.msra.mxu1 %v2620_v23  ;;  %1864 = vmatprep.subr.bf16.mxu0 %v2625_v24  ;;  %v2695_v23 = vld [vmem:[#allocation8 + $0x210] ss:$28 sps:$4 sm:$0xff]  }
 0x167   :  { %1905 = vmatprep.subr.bf16.mxu1 %v2628_v25  ;;  %v2696_v24 = vld [vmem:[#allocation8 + $0x590] ss:$28 sps:$4 sm:$0xff]  }
 0x168   :  { %v2697_v25 = vld [vmem:[#allocation8 + $0x50] ss:$28 sps:$4 sm:$0xff]  }
 0x169   :  { %1865 = vmatpush2.bf16.msra.mxu0 %v2623_v26  ;;  %v2698_v26 = vld [vmem:[#allocation8 + $0x3d0] ss:$28 sps:$4 sm:$0xff]  }
 0x16a   :  { %1906 = vmatpush2.bf16.msra.mxu1 %v2626_v27  ;;  %1866 = vmatprep.subr.bf16.mxu0 %v2631_v28  ;;  %v2699_v27 = vld [vmem:[#allocation8 + $0x1d8] ss:$28 sps:$4 sm:$0xff]  }
 0x16b   :  { %1907 = vmatprep.subr.bf16.mxu1 %v2634_v29  ;;  %v2700_v28 = vld [vmem:[#allocation8 + $0x558] ss:$28 sps:$4 sm:$0xff]  }
 0x16c   :  { %v2701_v29 = vld [vmem:[#allocation8 + $0x18] ss:$28 sps:$4 sm:$0xff]  }
 0x16d   :  { %1867 = vmatpush2.bf16.msra.mxu0 %v2629_v30  ;;  %v2702_v30 = vld [vmem:[#allocation8 + $0x398] ss:$28 sps:$4 sm:$0xff]  }
 0x16e   :  { %1908 = vmatpush2.bf16.msra.mxu1 %v2632_v31  ;;  %1868 = vmatprep.subr.bf16.mxu0 %v2637_v32  ;;  %v2932_v31 = vld [vmem:[%s2959_s4] sm:$0xff]  ;;  %s2848_s4 = smov [#allocation10]  }
 0x16f   :  { %1909 = vmatprep.subr.bf16.mxu1 %v2640_v33  ;;  %v500_v32 = vrot.slane %v2932_v31, %v87_v15  ;;  %v504_v33 = vrot.slane %v2932_v31, %v91_v18  ;;  %s2065_s15 = sshll.u32 %s2848_s4, 4  ;;  %s2066_s15 = int_to_ptr.vmem [resolvable:$true] %s2065_s15 }
 0x170   :  { %s2811_s16 = scalar_lea.vmem %s2066_s15, 896  ;;  %p2816_p7 = scmp.lt.s32.totalorder %s2066_s15, %s2066_s15 }
 0x171   :  { %1869 = vmatpush2.bf16.msra.mxu0 %v2635_v34  ;;  %p2812_p6 = scmp.ne.s32.totalorder %s2066_s15, %s2811_s16  ;;  %p2817_p8 = scmp.lt.s32.totalorder %s2811_s16, %s2811_s16 }
 0x172   :  { %1910 = vmatpush2.bf16.msra.mxu1 %v2638_v35  ;;  %1870 = vmatprep.subr.bf16.mxu0 %v2643_v36 }
 0x173   :  { %1911 = vmatprep.subr.bf16.mxu1 %v2646_v37  ;;  %p2818_p9 = por %p2817_p8, %p2816_p7 }
 0x175   :  { %1871 = vmatpush2.bf16.msra.mxu0 %v2641_v39  ;;  %p2819_p10 = pnand %p2818_p9, %p2812_p6 }
 0x176   :  { %1912 = vmatpush2.bf16.msra.mxu1 %v2644_v40  ;;  %1872 = vmatprep.subr.bf16.mxu0 %v2649_v43 }
 0x177   :  { %1913 = vmatprep.subr.bf16.mxu1 %v2652_v44 }
 0x179   :  { %1873 = vmatpush2.bf16.msra.mxu0 %v2647_v46 }
 0x17a   :  { %1914 = vmatpush2.bf16.msra.mxu1 %v2650_v47  ;;  %1874 = vmatprep.subr.bf16.mxu0 %v2655_v48 }
 0x17b   :  { %1915 = vmatprep.subr.bf16.mxu1 %v2658_v49 }
 0x17d   :  { %1875 = vmatpush2.bf16.msra.mxu0 %v2653_v50 }
 0x17e   :  { %1916 = vmatpush2.bf16.msra.mxu1 %v2656_v51  ;;  %1876 = vmatprep.subr.bf16.mxu0 %v2661_v52 }
 0x17f   :  { %1917 = vmatprep.subr.bf16.mxu1 %v2664_v53 }
 0x181   :  { %1877 = vmatpush2.bf16.msra.mxu0 %v2659_v54  ;;  %v508_v54 = vrot.slane %v2932_v31, %v95_v16 }
 0x182   :  { %1918 = vmatpush2.bf16.msra.mxu1 %v2662_v55  ;;  %1878 = vmatprep.subr.bf16.mxu0 %v2667_v56  ;;  %v512_v55 = vrot.slane %v2932_v31, %v99_v19 }
 0x183   :  { %1919 = vmatprep.subr.bf16.mxu1 %v2670_v57 }
 0x185   :  { %1879 = vmatpush2.bf16.msra.mxu0 %v2665_v58 }
 0x186   :  { %1920 = vmatpush2.bf16.msra.mxu1 %v2668_v59  ;;  %2317 = vmatprep.subr.bf16.mxu0 %v2671_v60 }
 0x187   :  { %2339 = vmatprep.subr.bf16.mxu1 %v2672_v61 }
 0x188   :  { %1881 = vmatmul.mubr.bf16.vlgmr.msra.gmra.mxu0 %v2911_v45 }
 0x189   :  { %1922 = vmatmul.mubr.bf16.vlgmr.msra.gmra.mxu1 %v2905_v38  ;;  %2318 = vmatpush3.bf16.msra.mxu0 %v2673_v62 }
 0x18a   :  { %1962 = vmatprep.mubr.bf16.mxu0 %v2907_v41  ;;  %2340 = vmatpush3.bf16.msra.mxu1 %v2674_v63  ;;  %v2686_v41 = vld [vmem:[#allocation8 + $0x478] ss:$28 sps:$4 sm:$0xff]  }
 0x18b   :  { %2002 = vmatprep.mubr.bf16.mxu1 %v2909_v42  ;;  %2319 = vmatprep.subr.bf16.mxu0 %v2675_v0  ;;  %v2689_v42 = vld [vmem:[#allocation8 + $0xc0] ss:$28 sps:$4 sm:$0xff]  }
 0x18c   :  { %2341 = vmatprep.subr.bf16.mxu1 %v2676_v1 }
 0x18d   :  { %2320 = vmatpush3.bf16.msra.mxu0 %v2677_v2 }
 0x18e   :  { %2342 = vmatpush3.bf16.msra.mxu1 %v2678_v3  ;;  %2321 = vmatprep.subr.bf16.mxu0 %v2679_v4 }
 0x18f   :  { %2343 = vmatprep.subr.bf16.mxu1 %v2680_v5 }
 0x191   :  { %2322 = vmatpush3.bf16.msra.mxu0 %v2681_v6 }
 0x192   :  { %2344 = vmatpush3.bf16.msra.mxu1 %v2682_v7  ;;  %2323 = vmatprep.subr.bf16.mxu0 %v2683_v8 }
 0x193   :  { %2345 = vmatprep.subr.bf16.mxu1 %v2684_v9 }
 0x195   :  { %2324 = vmatpush3.bf16.msra.mxu0 %v2685_v10  ;;  %v515_v10 = vsub.s32 4, %v2891_v14 }
 0x196   :  { %2346 = vmatpush3.bf16.msra.mxu1 %v2686_v41  ;;  %2325 = vmatprep.subr.bf16.mxu0 %v2687_v11  ;;  %v519_v41 = vsub.s32 5, %v2891_v14 }
 0x197   :  { %2347 = vmatprep.subr.bf16.mxu1 %v2688_v12  ;;  %v516_v11 = vrot.slane %v2932_v31, %v515_v10 }
 0x198   :  { %v520_v12 = vrot.slane %v2932_v31, %v519_v41 }
 0x199   :  { %2326 = vmatpush3.bf16.msra.mxu0 %v2689_v42 }
 0x19a   :  { %2348 = vmatpush3.bf16.msra.mxu1 %v2690_v13  ;;  %2327 = vmatprep.subr.bf16.mxu0 %v2691_v17 }
 0x19b   :  { %2349 = vmatprep.subr.bf16.mxu1 %v2692_v20 }
 0x19d   :  { %2328 = vmatpush3.bf16.msra.mxu0 %v2693_v21 }
 0x19e   :  { %2350 = vmatpush3.bf16.msra.mxu1 %v2694_v22  ;;  %2329 = vmatprep.subr.bf16.mxu0 %v2695_v23 }
 0x19f   :  { %2351 = vmatprep.subr.bf16.mxu1 %v2696_v24 }
 0x1a1   :  { %2330 = vmatpush3.bf16.msra.mxu0 %v2697_v25 }
 0x1a2   :  { %2352 = vmatpush3.bf16.msra.mxu1 %v2698_v26  ;;  %2331 = vmatprep.subr.bf16.mxu0 %v2699_v27 }
 0x1a3   :  { %2353 = vmatprep.subr.bf16.mxu1 %v2700_v28 }
 0x1a5   :  { %2332 = vmatpush3.bf16.msra.mxu0 %v2701_v29 }
 0x1a6   :  { %2354 = vmatpush3.bf16.msra.mxu1 %v2702_v30 }
 0x1a8   :  { %1963 = vmatmul.mubr.bf16.vlgmr.msra.gmra.mxu0 %v2911_v45 }
 0x1a9   :  { %2003 = vmatmul.mubr.bf16.vlgmr.msra.gmra.mxu1 %v2905_v38 }
 0x1c8   :  { %v1718_v34 = vpop.f32.mrf.mxu0  ;;  %v1759_v35 = vpop.f32.mrf.mxu1 }
 0x1c9   :  { %v1719_v36 = vadd.f32 %v1718_v34, %v500_v32 }
 0x1ca   :  { %v1720_v37 = vpop.f32.mrf.mxu0  ;;  %v1761_v45 = vpop.f32.mrf.mxu1 }
 0x1cb   :  { %v1760_v39 = vadd.f32 %v1759_v35, %v1719_v36  ;;  %v1721_v38 = vadd.f32 %v1720_v37, %v504_v33  ;;  %v523_v36 = vsub.s32 6, %v2891_v14 }
 0x1cc   :  { %v1722_v40 = vpop.f32.mrf.mxu0  ;;  %v1763_v43 = vpop.f32.mrf.mxu1 }
 0x1cd   :  { %v2310_v44 = vmul.f32 -1.442695, %v1760_v39  ;;  %v1762_v46 = vadd.f32 %v1761_v45, %v1721_v38  ;;  %v524_v39 = vrot.slane %v2932_v31, %v523_v36 }
 0x1ce   :  { %v1723_v47 = vpop.f32.mrf.mxu0  ;;  %v1764_v48 = vpop.f32.mrf.mxu1 }
 0x1cf   :  { %2703 = vpow2.f32 %v2310_v44  ;;  %v2311_v49 = vmul.f32 -1.442695, %v1762_v46 }
 0x1d1   :  { %2705 = vpow2.f32 %v2311_v49 }
 0x1dc   :  { %v2704_v15 = vpop.eup %2703 }
 0x1dd   :  { %v2031_v50 = vadd.f32 1.0, %v2704_v15 }
 0x1de   :  { %v2706_v51 = vpop.eup %2705 }
 0x1df   :  { %2707 = vrcp.f32 %v2031_v50  ;;  %v2032_v18 = vadd.f32 1.0, %v2706_v51 }
 0x1e1   :  { %2709 = vrcp.f32 %v2032_v18 }
 0x1ec   :  { %v2708_v52 = vpop.eup %2707 }
 0x1ed   :  { %2052 = vst [vmem:[#allocation10] sm:$0xff] %v2708_v52 }
 0x1ee   :  { %v2710_v53 = vpop.eup %2709 }
 0x1ef   :  { %2053 = vst [vmem:[#allocation10 + $0x8] sm:$0xff] %v2710_v53 }
 0x208   :  { %v1800_v56 = vpop.f32.mrf.mxu0  ;;  %v1841_v57 = vpop.f32.mrf.mxu1 }
 0x209   :  { %v1801_v58 = vadd.f32 %v1800_v56, %v508_v54 }
 0x20a   :  { %v1802_v59 = vpop.f32.mrf.mxu0  ;;  %v1843_v60 = vpop.f32.mrf.mxu1 }
 0x20b   :  { %v1842_v61 = vadd.f32 %v1841_v57, %v1801_v58  ;;  %v1803_v62 = vadd.f32 %v1802_v59, %v512_v55 }
 0x20c   :  { %v1804_v63 = vpop.f32.mrf.mxu0  ;;  %v1845_v0 = vpop.f32.mrf.mxu1 }
 0x20d   :  { %v2312_v1 = vmul.f32 -1.442695, %v1842_v61  ;;  %v1844_v2 = vadd.f32 %v1843_v60, %v1803_v62 }
 0x20e   :  { %v1805_v3 = vpop.f32.mrf.mxu0  ;;  %v1846_v4 = vpop.f32.mrf.mxu1 }
 0x20f   :  { %2711 = vpow2.f32 %v2312_v1  ;;  %v2313_v5 = vmul.f32 -1.442695, %v1844_v2 }
 0x211   :  { %2713 = vpow2.f32 %v2313_v5 }
 0x21c   :  { %v2712_v16 = vpop.eup %2711 }
 0x21d   :  { %v2033_v6 = vadd.f32 1.0, %v2712_v16 }
 0x21e   :  { %v2714_v7 = vpop.eup %2713 }
 0x21f   :  { %2715 = vrcp.f32 %v2033_v6  ;;  %v2034_v19 = vadd.f32 1.0, %v2714_v7 }
 0x221   :  { %2717 = vrcp.f32 %v2034_v19 }
 0x22c   :  { %v2716_v8 = vpop.eup %2715 }
 0x22d   :  { %2054 = vst [vmem:[#allocation10 + $0x10] sm:$0xff] %v2716_v8 }
 0x22e   :  { %v2718_v9 = vpop.eup %2717 }
 0x22f   :  { %2055 = vst [vmem:[#allocation10 + $0x18] sm:$0xff] %v2718_v9 }
 0x248   :  { %v1882_v42 = vpop.f32.mrf.mxu0 }
 0x249   :  { %v1883_v13 = vadd.f32 %v1882_v42, %v516_v11  ;;  %v1923_v17 = vpop.f32.mrf.mxu1 }
 0x24a   :  { %v1884_v20 = vpop.f32.mrf.mxu0 }
 0x24b   :  { %v1924_v21 = vadd.f32 %v1923_v17, %v1883_v13  ;;  %v1885_v22 = vadd.f32 %v1884_v20, %v520_v12  ;;  %v1925_v23 = vpop.f32.mrf.mxu1 }
 0x24c   :  { %v1886_v24 = vpop.f32.mrf.mxu0 }
 0x24d   :  { %v2314_v25 = vmul.f32 -1.442695, %v1924_v21  ;;  %v1926_v26 = vadd.f32 %v1925_v23, %v1885_v22  ;;  %v1927_v27 = vpop.f32.mrf.mxu1 }
 0x24e   :  { %v1887_v28 = vpop.f32.mrf.mxu0 }
 0x24f   :  { %2719 = vpow2.f32 %v2314_v25  ;;  %v2315_v29 = vmul.f32 -1.442695, %v1926_v26  ;;  %v1928_v30 = vpop.f32.mrf.mxu1 }
 0x251   :  { %2721 = vpow2.f32 %v2315_v29 }
 0x25c   :  { %v2720_v32 = vpop.eup %2719 }
 0x25d   :  { %v2035_v33 = vadd.f32 1.0, %v2720_v32 }
 0x25e   :  { %v2722_v34 = vpop.eup %2721 }
 0x25f   :  { %2723 = vrcp.f32 %v2035_v33  ;;  %v2036_v35 = vadd.f32 1.0, %v2722_v34 }
 0x261   :  { %2725 = vrcp.f32 %v2036_v35 }
 0x268   :  { %v2333_v37 = vpop.f32.mrf.mxu0 }
 0x269   :  { %v2355_v45 = vpop.f32.mrf.mxu1 }
 0x26a   :  { %v2334_v38 = vpop.f32.mrf.mxu0 }
 0x26b   :  { %v2335_v40 = vadd.f32 %v2334_v38, %v2333_v37  ;;  %v2356_v43 = vpop.f32.mrf.mxu1 }
 0x26c   :  { %v2724_v44 = vpop.eup %2723  ;;  %v2336_v46 = vpop.f32.mrf.mxu0  ;;  %v2357_v48 = vadd.f32 %v2356_v43, %v2355_v45 }
 0x26d   :  { %2056 = vst [vmem:[#allocation10 + $0x20] sm:$0xff] %v2724_v44  ;;  %v1965_v47 = vadd.f32 %v2335_v40, %v524_v39  ;;  %v2358_v49 = vpop.f32.mrf.mxu1 }
 0x26e   :  { %v2726_v15 = vpop.eup %2725  ;;  %v2337_v50 = vpop.f32.mrf.mxu0 }
 0x26f   :  { %2057 = vst [vmem:[#allocation10 + $0x28] sm:$0xff] %v2726_v15  ;;  %v2005_v51 = vadd.f32 %v2357_v48, %v1965_v47  ;;  %v2359_v18 = vpop.f32.mrf.mxu1 }
 0x271   :  { %v2316_v52 = vmul.f32 -1.442695, %v2005_v51 }
 0x273   :  { %2727 = vpow2.f32 %v2316_v52 }
 0x280   :  { %v2728_v14 = vpop.eup %2727 }
 0x281   :  { %v2037_v53 = vadd.f32 1.0, %v2728_v14 }
 0x283   :  { %2729 = vrcp.f32 %v2037_v53 }
 0x290   :  { %v2730_v31 = vpop.eup %2729 }
 0x291   :  { %2058 = vst [vmem:[#allocation10 + $0x30] sm:$0xff] %v2730_v31 }
 0x292   :  { %2822 = shalt.err (!%p2819_p10)
}
 0x293   :  { %2068 = dma.vmem_to_hbm [thread:$0]  %s2066_s15, 896, %s2960_s5, [#allocation4]  }
 0x294   :  { %2837 = dma.done.wait [#allocation4], 896  }
 0x295   :  { %2838 = vsyncadd [#allocation4], 4294966400 }
 0x296   :  { %2072 = vsyncpa [#allocation3], 1 }
 0x297   :  { %2073 = vsyncpa [#allocation6], 1 }
 0x298   :  { %2074 = vsyncpa [#allocation9], 1 }
 0x299   :  { %2075 = vsyncpa [#allocation4], 1 }

</bundles_post_ra>
